<compile_context>
chip_gen: v5e
topology: v5e:2x2
jax: 0.10.0
libtpu: 0.0.40
codegen_flags: <defaults>
</compile_context>

<pallas_src>
import functools

import jax
import jax.numpy as jnp
from jax.experimental import pallas as pl
from jax.experimental.pallas import tpu as pltpu


# ---------------------------------------------------------------------------
# Kernels
# ---------------------------------------------------------------------------

def _se_fused_kernel(x_ref, w1t_ref, b1_ref, w2t_ref, b2_ref, o_ref, *, inv_hw):
    """Single-pass SE on a (Bt, C, HW) tile: squeeze + excite + rescale."""
    x = x_ref[...]                                             # input dtype

    # Squeeze: global average pool, f32 accumulation.  HW is the true
    # (unpadded) spatial size; the lane padding of the reduce is masked.
    y = jnp.sum(x, axis=2, dtype=jnp.float32) * inv_hw          # (Bt, C)

    # Excitation: Linear -> ReLU -> Linear -> Sigmoid (weights pre-transposed).
    h = jnp.dot(y, w1t_ref[...], preferred_element_type=jnp.float32) + b1_ref[...]
    h = jnp.maximum(h, 0.0)                                      # (Bt, Cr)
    z = jnp.dot(h, w2t_ref[...], preferred_element_type=jnp.float32) + b2_ref[...]
    z = jax.nn.sigmoid(z)                                        # (Bt, C)

    # Rescale in the input dtype (no full-tile f32 cast of x).
    o_ref[...] = x * z.astype(x.dtype)[:, :, None]


def _squeeze_excite_kernel(x_ref, w1t_ref, b1_ref, w2t_ref, b2_ref, z_ref,
                           acc_ref, *, inv_hw, hw, hw_t):
    """Spatial-split pass 1: accumulate the squeeze over HW tiles, compute the
    per-(batch, channel) gates at the last HW step."""
    j = pl.program_id(1)

    @pl.when(j == 0)
    def _():
        acc_ref[...] = jnp.zeros_like(acc_ref)

    x = x_ref[...].astype(jnp.float32)                           # (Bt, C, hw_t)
    # The last HW tile may be partial: mask lanes beyond the true extent.
    lane = jax.lax.broadcasted_iota(jnp.int32, x.shape, 2)
    x = jnp.where(j * hw_t + lane < hw, x, 0.0)
    acc_ref[...] += jnp.sum(x, axis=2)                           # (Bt, C)

    @pl.when(j == pl.num_programs(1) - 1)
    def _():
        y = acc_ref[...] * inv_hw
        h = jnp.dot(y, w1t_ref[...], preferred_element_type=jnp.float32) + b1_ref[...]
        h = jnp.maximum(h, 0.0)
        z = jnp.dot(h, w2t_ref[...], preferred_element_type=jnp.float32) + b2_ref[...]
        z_ref[...] = jax.nn.sigmoid(z)[:, :, None]               # (Bt, C, 1)


def _rescale_kernel(x_ref, z_ref, o_ref):
    """Spatial-split pass 2: out = x * z (gates broadcast over HW)."""
    x = x_ref[...]
    o_ref[...] = x * z_ref[...].astype(x.dtype)


# ---------------------------------------------------------------------------
# VMEM budgeting (generation aware)
# ---------------------------------------------------------------------------

_VMEM_CAP_CACHE = []


def _vmem_capacity_bytes():
    if not _VMEM_CAP_CACHE:
        cap = 64 << 20                                   # conservative (v7x)
        try:
            info = pltpu.get_tpu_info()
            cap = int(getattr(info, "vmem_capacity_bytes", cap)) or cap
        except Exception:
            pass
        _VMEM_CAP_CACHE.append(cap)
    return _VMEM_CAP_CACHE[0]


def _block_budget(weight_bytes):
    cap = _vmem_capacity_bytes()
    if cap >= (100 << 20):                  # v5e / v6e: 128 MiB physical VMEM
        budget, vmem_limit = 56 << 20, 100 << 20
    else:                                   # v7x: 64 MiB physical VMEM
        budget, vmem_limit = 22 << 20, 48 << 20
    # Weights/biases are double-buffered by the pipeline; charge them so the
    # x/out blocks keep headroom.
    budget = max(budget - 2 * weight_bytes, 4 << 20)
    return budget, vmem_limit


# ---------------------------------------------------------------------------
# Wrapper
# ---------------------------------------------------------------------------

@functools.partial(jax.jit, static_argnames=("force_spatial_split",))
def se_module(x, w1, b1, w2, b2, *, force_spatial_split=False):
    """x: (B, C, H, W). Weights follow torch.nn.Linear conventions:
       w1: (C//r, C), b1: (C//r,), w2: (C, C//r), b2: (C,)."""
    B, C, H, W = x.shape
    HW = H * W
    Cr = w1.shape[0]

    x_flat = x.reshape(B, C, HW)                         # contiguous: free
    w1t = w1.T.astype(jnp.float32)                       # (C, Cr)
    w2t = w2.T.astype(jnp.float32)                       # (Cr, C)
    b1_2d = b1.reshape(1, Cr).astype(jnp.float32)
    b2_2d = b2.reshape(1, C).astype(jnp.float32)

    itemsize = jnp.dtype(x.dtype).itemsize
    weight_bytes = 4 * (w1t.size + w2t.size + b1_2d.size + b2_2d.size)
    budget, vmem_limit = _block_budget(weight_bytes)

    c_pad = -(-C // 8) * 8                               # sublane-padded C
    hw_pad = -(-HW // 128) * 128                         # lane-padded HW (VMEM only)
    per_row = c_pad * hw_pad * itemsize                  # one batch row of x (== out)

    spatial_split = force_spatial_split or (4 * per_row > budget)

    if not spatial_split:
        # ---- fused single-pass path: whole (C, HW) rows per grid step ----
        bt = max(1, min(B, budget // (4 * per_row)))
        # Keep >= 2 grid steps when B > 1 so the 'parallel' batch axis can
        # shard across v7x's two TensorCores (no-op on single-TC v5e/v6e).
        if bt >= B and B > 1:
            bt = (B + 1) // 2
        grid = (pl.cdiv(B, bt),)                         # partial block: masked store

        kernel = functools.partial(_se_fused_kernel, inv_hw=1.0 / float(HW))
        out_flat = pl.pallas_call(
            kernel,
            out_shape=jax.ShapeDtypeStruct((B, C, HW), x.dtype),
            grid_spec=pltpu.PrefetchScalarGridSpec(
                num_scalar_prefetch=0,
                grid=grid,
                in_specs=[
                    pl.BlockSpec((bt, C, HW), lambda b: (b, 0, 0)),   # x
                    pl.BlockSpec((C, Cr), lambda b: (0, 0)),          # W1^T
                    pl.BlockSpec((1, Cr), lambda b: (0, 0)),          # b1
                    pl.BlockSpec((Cr, C), lambda b: (0, 0)),          # W2^T
                    pl.BlockSpec((1, C), lambda b: (0, 0)),           # b2
                ],
                out_specs=pl.BlockSpec((bt, C, HW), lambda b: (b, 0, 0)),
            ),
            compiler_params=pltpu.CompilerParams(
                dimension_semantics=("parallel",),
                vmem_limit_bytes=vmem_limit,
            ),
        )(x_flat, w1t, b1_2d, w2t, b2_2d)
    else:
        # ---- spatial-split fallback: a single (C, HW) row overflows VMEM ----
        bt = 1
        hw_t = max((budget // (4 * c_pad * itemsize)) // 128 * 128, 128)
        if force_spatial_split:
            hw_t = min(hw_t, 128)            # small tiles so tests hit accumulation
        if hw_t >= HW:
            hw_t = HW                        # single spatial tile (block == full dim)
        nb, nhw = pl.cdiv(B, bt), pl.cdiv(HW, hw_t)

        sq_kernel = functools.partial(_squeeze_excite_kernel,
                                      inv_hw=1.0 / float(HW), hw=HW, hw_t=hw_t)
        z = pl.pallas_call(
            sq_kernel,
            out_shape=jax.ShapeDtypeStruct((B, C, 1), jnp.float32),
            grid_spec=pltpu.PrefetchScalarGridSpec(
                num_scalar_prefetch=0,
                grid=(nb, nhw),
                in_specs=[
                    pl.BlockSpec((bt, C, hw_t), lambda b, j: (b, 0, j)),  # x tile
                    pl.BlockSpec((C, Cr), lambda b, j: (0, 0)),
                    pl.BlockSpec((1, Cr), lambda b, j: (0, 0)),
                    pl.BlockSpec((Cr, C), lambda b, j: (0, 0)),
                    pl.BlockSpec((1, C), lambda b, j: (0, 0)),
                ],
                out_specs=pl.BlockSpec((bt, C, 1), lambda b, j: (b, 0, 0)),
                scratch_shapes=[pltpu.VMEM((bt, C), jnp.float32)],
            ),
            compiler_params=pltpu.CompilerParams(
                dimension_semantics=("parallel", "arbitrary"),
                vmem_limit_bytes=vmem_limit,
            ),
        )(x_flat, w1t, b1_2d, w2t, b2_2d)

        out_flat = pl.pallas_call(
            _rescale_kernel,
            out_shape=jax.ShapeDtypeStruct((B, C, HW), x.dtype),
            grid_spec=pltpu.PrefetchScalarGridSpec(
                num_scalar_prefetch=0,
                grid=(nb, nhw),
                in_specs=[
                    pl.BlockSpec((bt, C, hw_t), lambda b, j: (b, 0, j)),  # x tile
                    pl.BlockSpec((bt, C, 1), lambda b, j: (b, 0, 0)),     # gates
                ],
                out_specs=pl.BlockSpec((bt, C, hw_t), lambda b, j: (b, 0, j)),
            ),
            compiler_params=pltpu.CompilerParams(
                dimension_semantics=("parallel", "parallel"),
                vmem_limit_bytes=vmem_limit,
            ),
        )(x_flat, z)

    return out_flat.reshape(B, C, H, W)


# ---------------------------------------------------------------------------
# Reference + test harness
# ---------------------------------------------------------------------------

def _torch_linear_init(key, out_features, in_features):
    """Deterministic init mimicking torch.nn.Linear defaults (uniform ±1/sqrt(fan_in))."""
    kw, kb = jax.random.split(key)
    bound = 1.0 / (in_features ** 0.5)
    w = jax.random.uniform(kw, (out_features, in_features), jnp.float32, -bound, bound)
    b = jax.random.uniform(kb, (out_features,), jnp.float32, -bound, bound)
    return w, b


def _reference(x, w1, b1, w2, b2):
    # Pure-JAX reference of SE_module.forward.
    y = jnp.mean(x, axis=(2, 3))                             # (B, C)
    h = jnp.maximum(y @ w1.T + b1, 0.0)                      # (B, C//r)
    z = jax.nn.sigmoid(h @ w2.T + b2)                        # (B, C)
    return x * z[:, :, None, None]


if __name__ == "__main__":
    # channel=32, ratio=16 -> hidden = 2 (channel must be >= ratio, as in torch module)
    B, C, H, W = 2, 32, 16, 16
    ratio = 16
    Cr = C // ratio

    key = jax.random.PRNGKey(0)
    kx, k1, k2 = jax.random.split(key, 3)

    x = jax.random.normal(kx, (B, C, H, W), jnp.float32)
    w1, b1 = _torch_linear_init(k1, Cr, C)   # Linear(C -> C//ratio)
    w2, b2 = _torch_linear_init(k2, C, Cr)   # Linear(C//ratio -> C)

    # 1) Fused path, 128-multiple HW.
    out = jax.block_until_ready(se_module(x, w1, b1, w2, b2))
    ref = _reference(x, w1, b1, w2, b2)
    assert out.shape == (B, C, H, W)
    assert jnp.allclose(out, ref, atol=1e-5, rtol=1e-5), "mismatch vs reference"

    # 2) Fused path with non-multiple-of-128 spatial size (7x7, typical SE
    #    stage): checks the masked lane-sum / masked store of the unpadded HW.
    x2 = jax.random.normal(kx, (4, C, 7, 7), jnp.float32)
    out2 = jax.block_until_ready(se_module(x2, w1, b1, w2, b2))
    ref2 = _reference(x2, w1, b1, w2, b2)
    assert jnp.allclose(out2, ref2, atol=1e-5, rtol=1e-5), "mismatch (non-128 HW)"

    # 3) Odd batch (B=3) + non-128 HW: exercises the cdiv grid with a masked
    #    partial trailing batch block.
    x3 = jax.random.normal(kx, (3, C, 9, 9), jnp.float32)
    out3 = jax.block_until_ready(se_module(x3, w1, b1, w2, b2))
    ref3 = _reference(x3, w1, b1, w2, b2)
    assert jnp.allclose(out3, ref3, atol=1e-5, rtol=1e-5), "mismatch (partial batch block)"

    # 4) Spatial-split fallback path (used when a C*HW row exceeds the VMEM
    #    budget), forced here at a small shape to validate the two-pass logic.
    out4 = jax.block_until_ready(se_module(x, w1, b1, w2, b2, force_spatial_split=True))
    assert jnp.allclose(out4, ref, atol=1e-5, rtol=1e-5), "mismatch (spatial-split path)"

    print("KERNEL_OK")
</pallas_src>

<mosaic_0001>
module attributes {stable_mosaic.version = 11 : i64} {
  func.func @_se_fused_kernel(%arg0: i32, %arg1: memref<1x32x256xf32, #tpu.memory_space<vmem>>, %arg2: memref<32x2xf32, #tpu.memory_space<vmem>>, %arg3: memref<1x2xf32, #tpu.memory_space<vmem>>, %arg4: memref<2x32xf32, #tpu.memory_space<vmem>>, %arg5: memref<1x32xf32, #tpu.memory_space<vmem>>, %arg6: memref<1x32x256xf32, #tpu.memory_space<vmem>>) attributes {dimension_semantics = [#tpu.dimension_semantics<parallel>], iteration_bounds = array<i64: 2>, scalar_prefetch = 0 : i64, scratch_operands = 0 : i64, tpu.core_type = #tpu.core_type<tc>, window_params = [{transform_indices = @transform_0, window_bounds = array<i64: 1, 32, 256>}, {pipeline_mode = #tpu.pipeline_mode<synchronous>, transform_indices = @transform_1, window_bounds = array<i64: 32, 2>}, {pipeline_mode = #tpu.pipeline_mode<synchronous>, transform_indices = @transform_2, window_bounds = array<i64: 1, 2>}, {pipeline_mode = #tpu.pipeline_mode<synchronous>, transform_indices = @transform_3, window_bounds = array<i64: 2, 32>}, {pipeline_mode = #tpu.pipeline_mode<synchronous>, transform_indices = @transform_4, window_bounds = array<i64: 1, 32>}, {transform_indices = @transform_5, window_bounds = array<i64: 1, 32, 256>}]} {
    %c0 = arith.constant 0 : index
    %c0_0 = arith.constant 0 : index
    %c0_1 = arith.constant 0 : index
    %0 = vector.load %arg1[%c0, %c0_0, %c0_1] : memref<1x32x256xf32, #tpu.memory_space<vmem>>, vector<1x32x256xf32>
    %cst = arith.constant dense<0.000000e+00> : vector<1x32xf32>
    %1 = vector.multi_reduction <add>, %0, %cst [2] : vector<1x32x256xf32> to vector<1x32xf32>
    %cst_2 = arith.constant 3.906250e-03 : f32
    %2 = vector.broadcast %cst_2 : f32 to vector<1x32xf32>
    %3 = arith.mulf %1, %2 : vector<1x32xf32>
    %c0_3 = arith.constant 0 : index
    %c0_4 = arith.constant 0 : index
    %4 = vector.load %arg2[%c0_3, %c0_4] : memref<32x2xf32, #tpu.memory_space<vmem>>, vector<32x2xf32>
    %cst_5 = arith.constant dense<0.000000e+00> : vector<1x2xf32>
    %5 = tpu.matmul %3, %4, %cst_5 {dimension_numbers = #tpu.dot_dimension_numbers<[1], [0], [0], [1], [0, 0, 1, 1], [], []>} : vector<1x32xf32>, vector<32x2xf32>, vector<1x2xf32> -> vector<1x2xf32>
    %c0_6 = arith.constant 0 : index
    %c0_7 = arith.constant 0 : index
    %6 = vector.load %arg3[%c0_6, %c0_7] : memref<1x2xf32, #tpu.memory_space<vmem>>, vector<1x2xf32>
    %7 = arith.addf %5, %6 : vector<1x2xf32>
    %cst_8 = arith.constant 0.000000e+00 : f32
    %8 = vector.broadcast %cst_8 : f32 to vector<1x2xf32>
    %9 = arith.maximumf %7, %8 : vector<1x2xf32>
    %c0_9 = arith.constant 0 : index
    %c0_10 = arith.constant 0 : index
    %10 = vector.load %arg4[%c0_9, %c0_10] : memref<2x32xf32, #tpu.memory_space<vmem>>, vector<2x32xf32>
    %cst_11 = arith.constant dense<0.000000e+00> : vector<1x32xf32>
    %11 = tpu.matmul %9, %10, %cst_11 {dimension_numbers = #tpu.dot_dimension_numbers<[1], [0], [0], [1], [0, 0, 1, 1], [], []>} : vector<1x2xf32>, vector<2x32xf32>, vector<1x32xf32> -> vector<1x32xf32>
    %c0_12 = arith.constant 0 : index
    %c0_13 = arith.constant 0 : index
    %12 = vector.load %arg5[%c0_12, %c0_13] : memref<1x32xf32, #tpu.memory_space<vmem>>, vector<1x32xf32>
    %13 = arith.addf %11, %12 : vector<1x32xf32>
    %14 = arith.negf %13 : vector<1x32xf32>
    %15 = math.exp %14 : vector<1x32xf32>
    %cst_14 = arith.constant 1.000000e+00 : f32
    %16 = vector.broadcast %cst_14 : f32 to vector<1x32xf32>
    %17 = arith.addf %16, %15 : vector<1x32xf32>
    %18 = arith.divf %16, %17 : vector<1x32xf32>
    %19 = vector.shape_cast %18 : vector<1x32xf32> to vector<1x32x1xf32>
    %20 = vector.broadcast %19 : vector<1x32x1xf32> to vector<1x32x256xf32>
    %21 = arith.mulf %0, %20 : vector<1x32x256xf32>
    %c0_15 = arith.constant 0 : index
    %c0_16 = arith.constant 0 : index
    %c0_17 = arith.constant 0 : index
    %22 = vector.load %arg6[%c0_15, %c0_16, %c0_17] : memref<1x32x256xf32, #tpu.memory_space<vmem>>, vector<1x32x256xf32>
    tpu.vector_store %arg6[%c0_15, %c0_16, %c0_17], %21 {strides = array<i32>} : memref<1x32x256xf32, #tpu.memory_space<vmem>>, vector<1x32x256xf32>,
    return
  }
  func.func @transform_0(%arg0: i32) -> (i32, i32, i32) {
    %c0_i32 = arith.constant 0 : i32
    %c0_i32_0 = arith.constant 0 : i32
    %c0_i32_1 = arith.constant 0 : i32
    return %arg0, %c0_i32, %c0_i32_0 : i32, i32, i32
  }
  func.func @transform_1(%arg0: i32) -> (i32, i32) {
    %c0_i32 = arith.constant 0 : i32
    %c0_i32_0 = arith.constant 0 : i32
    %c0_i32_1 = arith.constant 0 : i32
    return %c0_i32, %c0_i32_0 : i32, i32
  }
  func.func @transform_2(%arg0: i32) -> (i32, i32) {
    %c0_i32 = arith.constant 0 : i32
    %c0_i32_0 = arith.constant 0 : i32
    %c0_i32_1 = arith.constant 0 : i32
    return %c0_i32, %c0_i32_0 : i32, i32
  }
  func.func @transform_3(%arg0: i32) -> (i32, i32) {
    %c0_i32 = arith.constant 0 : i32
    %c0_i32_0 = arith.constant 0 : i32
    %c0_i32_1 = arith.constant 0 : i32
    return %c0_i32, %c0_i32_0 : i32, i32
  }
  func.func @transform_4(%arg0: i32) -> (i32, i32) {
    %c0_i32 = arith.constant 0 : i32
    %c0_i32_0 = arith.constant 0 : i32
    %c0_i32_1 = arith.constant 0 : i32
    return %c0_i32, %c0_i32_0 : i32, i32
  }
  func.func @transform_5(%arg0: i32) -> (i32, i32, i32) {
    %c0_i32 = arith.constant 0 : i32
    %c0_i32_0 = arith.constant 0 : i32
    %c0_i32_1 = arith.constant 0 : i32
    return %arg0, %c0_i32, %c0_i32_0 : i32, i32, i32
  }
}

</mosaic_0001>

<bundles_post_ra>
// kernel: se_module.1
= control target key start
LH: loop header
LB: loop body
LE: loop exit
PB: predicated region body
PF: predicated region fallthrough
CT: control target
= control target key end

     0   :  { %s514_s18 = smov 0   ;;  %s591_s0 = inlined_call_operand.vmem [shape: f32[2,32,256], index: 0, kind: input, shape index: {}]   ;;  %s592_s1 = inlined_call_operand.vmem [shape: f32[32,2], index: 1, kind: input, shape index: {}]   ;;  %s593_s2 = inlined_call_operand.vmem [shape: f32[1,2], index: 2, kind: input, shape index: {}]   ;;  %s594_s3 = inlined_call_operand.vmem [shape: f32[2,32], index: 3, kind: input, shape index: {}]   ;;  %s595_s4 = inlined_call_operand.vmem [shape: f32[1,32], index: 4, kind: input, shape index: {}]   ;;  %s596_s5 = inlined_call_operand.vmem [shape: f32[2,32,256], index: 5, kind: output, shape index: {}]  }
   0x1 LB: > { %s442_s19 = sadd.s32 4294967295, %s482_s18   ;;  %p446_p0 = scmp.ge.s32.totalorder %s482_s18, 1  ;;  %s482_s18 = sphi %s514_s18, %s15_s18  }
   0x2   : > { %p187_p1 = scmp.lt.s32.totalorder %s482_s18, 3 }
   0x4   : > { %p188_p2 = pnand %p446_p0, %p187_p1 }
   0x5   : > { %p215_p3 = scmp.lt.s32.totalorder (!%p188_p2), %s442_s19, 1 }
   0x6   : > { %191 = sbr.rel (%p188_p2) target bundleno = 557 (0x22d), region = 40 }
   0xb   : > { %s598_s19 = smov (!%p215_p3, %s442_s19), 1  ;;  %v252_v12 = vld [vmem:[%s592_s1 + $0x18] sm:$0xff]  ;;  %v251_v13 = vld [vmem:[%s592_s1 + $0x10] sm:$0xff]  ;;  %v250_v14 = vld [vmem:[%s592_s1 + $0x8] sm:$0xff]  ;;  %v258_v16 = vlaneseq  ;;  %vm263_vm0 = vcmask 130112   ;;  %vm267_vm1 = vcmask 195712  }
   0xc   : > { %s457_s20 = sshll.u32 %s598_s19, 6  ;;  %288 = vmatpush.msra.mxu0 %v252_v12  ;;  %v249_v15 = vld [vmem:[%s592_s1] sm:$0xff]  ;;  %vm271_vm2 = vcmask 261312   ;;  %vm273_vm3 = vcmask 261120   ;;  %vm303_vm4 = vcmask 1041408   ;;  %vm299_vm5 = vcmask 15360  }
   0xd   : > { %s219_s23 = scalar_lea.vmem %s591_s0, %s457_s20  ;;  %v259_v19 = vand.u32 127, %v258_v16  ;;  %v297_v36 = vld [vmem:[%s594_s3] sm:$0x3]  ;;  %v348_v41 = vshrl.u32 %v258_v16, 7  ;;  %s224_s15 = scalar_lea.vmem %s596_s5, %s457_s20 }
   0xe   : > { %v530_v0 = vld [vmem:[%s219_s23] sm:$0xff]  ;;  %v532_v1 = vld [vmem:[%s219_s23 + $0x8] sm:$0xff]  ;;  %v542_v6 = vld [vmem:[%s219_s23 + $0x10] sm:$0xff]  ;;  %289 = vmatpush.msra.mxu0 %v251_v13  ;;  %452 = vmatpush.msk.msra.mxu1 %vm303_vm4, %v297_v36 }
   0xf   : > { %v534_v2 = vld [vmem:[%s219_s23 + $0x20] sm:$0xff]  ;;  %v233_v3 = vadd.f32 %v532_v1, %v530_v0  ;;  %v538_v4 = vld [vmem:[%s219_s23 + $0x28] sm:$0xff]  ;;  %v544_v7 = vld [vmem:[%s219_s23 + $0x18] sm:$0xff]  ;;  %v261_v21 = vadd.s32 4294967288, %v259_v19  ;;  %v265_v22 = vadd.s32 4294967280, %v259_v19  ;;  %v269_v25 = vadd.s32 4294967272, %v259_v19  ;;  %467 = vset.pattern.permute.xlu2 %v348_v41 }
  0x10   : > { %v239_v5 = vadd.f32 %v538_v4, %v534_v2  ;;  %v546_v8 = vld [vmem:[%s219_s23 + $0x30] sm:$0xff]  ;;  %v548_v9 = vld [vmem:[%s219_s23 + $0x38] sm:$0xff]  ;;  %v236_v10 = vadd.f32 %v544_v7, %v542_v6  ;;  %290 = vmatpush.msra.mxu0 %v250_v14  ;;  %v253_v37 = vld [vmem:[%s593_s2] sm:$0x1]  ;;  %v367_v42 = vadd.s32 24, %v348_v41  ;;  %v361_v43 = vadd.s32 16, %v348_v41 }
  0x11   : > { %234 = vadd.xlane.f32.xlu0 %v233_v3  ;;  %v242_v11 = vadd.f32 %v548_v9, %v546_v8  ;;  %v298_v44 = vld [vmem:[%s595_s4] sm:$0x1]  ;;  %v355_v61 = vadd.s32 8, %v348_v41 }
  0x12   : > { %240 = vadd.xlane.f32.xlu1 %v239_v5  ;;  %291 = vmatpush.msra.mxu0 %v249_v15 }
  0x13   : > { %470 = vset.pattern.permute.xlu1 %v367_v42  ;;  %469 = vset.pattern.permute.xlu0 %v361_v43 }
  0x19   : > { %237 = vadd.xlane.f32.xlu0 %v236_v10 }
  0x1a   : > { %243 = vadd.xlane.f32.xlu1 %v242_v11 }
  0x84   : > { %v235_v17 = vpop.xlane.xlu0 %234 }
  0x85   : > { %v241_v18 = vpop.xlane.xlu1 %240  ;;  %v245_v20 = vmul.f32 0.00390625, %v235_v17 }
  0x86   : > { %v247_v23 = vmul.f32 0.00390625, %v241_v18 }
  0x87   : > { %v260_v29 = vperm.slane %v245_v20, %v259_v19 }
  0x88   : > { %v266_v31 = vperm.slane %v247_v23, %v265_v22 }
  0x8c   : > { %v238_v24 = vpop.xlane.xlu0 %237 }
  0x8d   : > { %v246_v26 = vmul.f32 0.00390625, %v238_v24  ;;  %v244_v27 = vpop.xlane.xlu1 %243 }
  0x8e   : > { %v248_v28 = vmul.f32 0.00390625, %v244_v27 }
  0x8f   : > { %v262_v30 = vperm.slane %v246_v26, %v261_v21 }
  0x90   : > { %v270_v32 = vperm.slane %v248_v28, %v269_v25 }
  0x91   : > { %v264_v33 = vsel %vm263_vm0, %v262_v30, %v260_v29 }
  0x92   : > { %v268_v34 = vsel %vm267_vm1, %v266_v31, %v264_v33 }
  0x93   : > { %v272_v35 = vsel %vm271_vm2, %v270_v32, %v268_v34 }
  0x94   : > { %451 = vmatmul.msk.f32.vlgmr.msra.gmra.mxu0 %vm273_vm3, %v272_v35 }
 0x111   : > { %v293_v38 = vpop.f32.mrf.mxu0 }
 0x112   : > { %v294_v39 = vadd.f32 %v293_v38, %v253_v37 }
 0x114   : > { %v296_v40 = vmax.f32 %v294_v39, 0.0 }
 0x116   : > { %453 = vmatmul.msk.f32.vlgmr.msra.gmra.mxu1 %vm299_vm5, %v296_v40 }
 0x193   : > { %v324_v45 = vpop.f32.mrf.mxu1 }
 0x194   : > { %v325_v46 = vadd.f32 %v324_v45, %v298_v44 }
 0x196   : > { %v454_v47 = vmul.f32 -1.442695, %v325_v46 }
 0x198   : > { %472 = vpow2.f32 %v454_v47 }
 0x19e   : > { %v473_v48 = vpop.eup %472 }
 0x19f   : > { %v330_v49 = vadd.f32 1.0, %v473_v48 }
 0x1a1   : > { %474 = vrcp.f32 %v330_v49  ;;  %v342_v53 = vand.u32 2147483648, %v330_v49  ;;  %v340_v55 = vand.u32 2147483647, %v330_v49  ;;  %vm336_vm7 = vweird.f32 %v330_v49 }
 0x1a3   : > { %v343_v57 = vor.u32 1.1754944e-38, %v342_v53  ;;  %vm341_vm9 = vcmp.eq.f32.partialorder %v340_v55, 8.507059e+37 }
 0x1a7   : > { %v475_v50 = vpop.eup %474 }
 0x1a8   : > { %v332_v51 = vmul.f32 %v475_v50, %v330_v49  ;;  %vm337_vm6 = vweird.f32 %v475_v50 }
 0x1a9   : > { %vm338_vm8 = vmor %vm336_vm7, %vm337_vm6 }
 0x1aa   : > { %v333_v52 = vsub.f32 1.0, %v332_v51 }
 0x1ac   : > { %v334_v54 = vmul.f32 %v475_v50, %v333_v52 }
 0x1ae   : > { %v335_v56 = vadd.f32 %v475_v50, %v334_v54 }
 0x1b0   : > { %v339_v58 = vsel %vm338_vm8, %v475_v50, %v335_v56 }
 0x1b1   : > { %v344_v59 = vsel %vm341_vm9, %v343_v57, %v339_v58 }
 0x1b2   : > { %v346_v60 = vperm.slane %v344_v59, 0 }
 0x1b4   : > { %369 = vperm.xlu1 %470, %v346_v60   ;;  %363 = vperm.xlu0 %469, %v346_v60  }
 0x1b5   : > { %351 = vperm.xlu2 %467, %v346_v60  }
 0x1bc   : > { %471 = vset.pattern.permute.xlu0 %v367_v42 }
 0x1bd   : > { %468 = vset.pattern.permute.xlu2 %v355_v61 }
 0x1c5   : > { %357 = vperm.xlu2 %468, %v346_v60  }
 0x20f   : > { %v352_v62 = vpop.permute.xlu2 %351 }
 0x210   : > { %v371_v63 = vmul.f32 %v352_v62, %v530_v0  ;;  %v372_v3 = vmul.f32 %v352_v62, %v532_v1 }
 0x212   : > { %379 = vst [vmem:[%s224_s15] sm:$0xff] %v371_v63 }
 0x213   : > { %380 = vst [vmem:[%s224_s15 + $0x8] sm:$0xff] %v372_v3 }
 0x21f   : > { %v358_v5 = vpop.permute.xlu2 %357 }
 0x220   : > { %v373_v10 = vmul.f32 %v358_v5, %v542_v6  ;;  %v374_v11 = vmul.f32 %v358_v5, %v544_v7 }
 0x222   : > { %381 = vst [vmem:[%s224_s15 + $0x10] sm:$0xff] %v373_v10 }
 0x223   : > { %382 = vst [vmem:[%s224_s15 + $0x18] sm:$0xff] %v374_v11 }
 0x226   : > { %v370_v12 = vpop.permute.xlu1 %369  ;;  %v364_v13 = vpop.permute.xlu0 %363 }
 0x227   : > { %v377_v14 = vmul.f32 %v370_v12, %v546_v8  ;;  %v378_v15 = vmul.f32 %v370_v12, %v548_v9  ;;  %v375_v16 = vmul.f32 %v364_v13, %v534_v2  ;;  %v376_v0 = vmul.f32 %v364_v13, %v538_v4 }
 0x229   : > { %385 = vst [vmem:[%s224_s15 + $0x30] sm:$0xff] %v377_v14 }
 0x22a   : > { %386 = vst [vmem:[%s224_s15 + $0x38] sm:$0xff] %v378_v15 }
 0x22b   : > { %383 = vst [vmem:[%s224_s15 + $0x20] sm:$0xff] %v375_v16 }
 0x22c   : > { %384 = vst [vmem:[%s224_s15 + $0x28] sm:$0xff] %v376_v0 }
 0x22d PF: > { %s15_s18 = sadd.s32 1, %s482_s18  }
 0x22e   : > { %p12_p4 = scmp.ge.s32.totalorder %s15_s18, 4  }
 0x230   :  { %14 = sbr.rel (!%p12_p4) target bundleno = 1 (0x1), region = 70 }

</bundles_post_ra>
